<compile_context>
chip_gen: v5e
topology: v5e:2x2
jax: 0.10.0
libtpu: 0.0.40
codegen_flags: <defaults>
</compile_context>

<pallas_src>
import math

import jax
import jax.numpy as jnp
from jax.experimental import pallas as pl
from jax.experimental.pallas import tpu as pltpu

_INV_SQRT2 = 1.0 / math.sqrt(2.0)
_SQRT_2_OVER_PI = math.sqrt(2.0 / math.pi)


# --------------------------------------------------------------------------- #
# Kernel
# --------------------------------------------------------------------------- #
def _make_ffn_kernel(approximate):
    def kernel(x_ref, w1_ref, b1_ref, w2_ref, b2_ref, o_ref, acc_ref):
        # x_ref:   (tm, H)    token tile
        # w1_ref:  (H, tf)    layer1 weight slab, (in, out) layout
        # b1_ref:  (1, tf)    layer1 bias slab (f32)
        # w2_ref:  (tf, H)    layer2 weight slab, (in, out) layout
        # b2_ref:  (1, H)     layer2 bias (f32, resident)
        # o_ref:   (tm, H)    output tile (resident across the F axis)
        # acc_ref: (tm, H)    f32 accumulator in VMEM scratch
        j = pl.program_id(1)

        # layer1 slab: native-dtype operands straight to the MXU, f32 accum.
        h = jnp.dot(x_ref[...], w1_ref[...],
                    preferred_element_type=jnp.float32) + b1_ref[...]

        if approximate:
            # tanh GELU: transcendental goes to the otherwise-idle EUP slot.
            h = 0.5 * h * (1.0 + jnp.tanh(
                _SQRT_2_OVER_PI * (h + 0.044715 * h * h * h)))
        else:
            # exact (erf-based) GELU, matching torch.nn.GELU() default.
            h = 0.5 * h * (1.0 + jax.lax.erf(h * _INV_SQRT2))

        # cast back to weight dtype so the second matmul runs at native MXU
        # rate (bf16 x bf16 -> f32 for bf16 models; no-op for f32 models).
        h = h.astype(w2_ref.dtype)
        partial = jnp.dot(h, w2_ref[...], preferred_element_type=jnp.float32)

        @pl.when(j == 0)
        def _first():
            # Write directly: saves a full (tm, H) f32 zero-store + reload.
            acc_ref[...] = partial

        @pl.when(j != 0)
        def _accumulate():
            acc_ref[...] = acc_ref[...] + partial

        @pl.when(j == pl.num_programs(1) - 1)
        def _finalize():
            o_ref[...] = (acc_ref[...] + b2_ref[...]).astype(o_ref.dtype)

    return kernel


# --------------------------------------------------------------------------- #
# Helpers
# --------------------------------------------------------------------------- #
def _tpu_vmem_capacity_bytes():
    try:
        return int(pltpu.get_tpu_info().vmem_capacity_bytes)
    except Exception:
        # Conservative fallback (works on every generation, incl. v7x 64 MiB).
        return 64 * 1024 * 1024


def _choose_f_tile(f_pad, tile_f):
    """Largest multiple-of-128 divisor of f_pad that is <= tile_f."""
    cap = max(128, (min(tile_f, f_pad) // 128) * 128)
    for cand in range(cap, 0, -128):
        if f_pad % cand == 0:
            return cand
    return 128  # unreachable: f_pad is a multiple of 128


def prepare_ffn_params(w1, b1, w2, b2):
    """One-time conversion from torch nn.Linear layout to kernel layout.

    w1: (ffn, hidden), b1: (ffn,)      -- nn.Linear(hidden, ffn)
    w2: (hidden, ffn), b2: (hidden,)   -- nn.Linear(ffn, hidden)

    Returns (w1_t, b1_2d, w2_t, b2_2d) with weights in (in, out) layout, f32
    row-vector biases, and the FFN dim zero-padded to a multiple of 128.
    Do this at param-load time so the per-forward path never re-transposes.
    """
    w1 = jnp.asarray(w1)
    w2 = jnp.asarray(w2)
    ffn, hidden = w1.shape
    f_pad = ((ffn + 127) // 128) * 128

    w1_t = w1.T                                         # (hidden, ffn)
    w2_t = w2.T                                         # (ffn, hidden)
    b1_2d = jnp.asarray(b1).reshape(1, ffn).astype(jnp.float32)
    b2_2d = jnp.asarray(b2).reshape(1, hidden).astype(jnp.float32)

    if f_pad != ffn:
        # Zero padding is exact: GELU(0 + 0) == 0 and the padded W2 rows are
        # zero, so padded F columns contribute nothing to the output.
        w1_t = jnp.pad(w1_t, ((0, 0), (0, f_pad - ffn)))
        w2_t = jnp.pad(w2_t, ((0, f_pad - ffn), (0, 0)))
        b1_2d = jnp.pad(b1_2d, ((0, 0), (0, f_pad - ffn)))

    return w1_t, b1_2d, w2_t, b2_2d


# --------------------------------------------------------------------------- #
# Forward
# --------------------------------------------------------------------------- #
def feed_forward_network(x, w1_t, b1, w2_t, b2, *, tile_m=None, tile_f=512,
                         approximate=False, vmem_limit_bytes=None):
    """Fused Linear -> GELU -> Linear forward.

    Expects prepare_ffn_params() layout:
      w1_t: (hidden, F)   b1: (1, F) f32   w2_t: (F, hidden)   b2: (1, hidden)
    with F a multiple of 128.  x: (..., hidden).
    """
    orig_shape = x.shape
    hidden = orig_shape[-1]
    f_pad = w1_t.shape[1]
    assert w1_t.shape[0] == hidden and w2_t.shape == (f_pad, hidden)
    assert f_pad % 128 == 0, "use prepare_ffn_params() to pad the FFN dim"

    x2d = x.reshape(-1, hidden)
    m = x2d.shape[0]

    # --- generation-aware defaults ------------------------------------------
    vmem_cap = _tpu_vmem_capacity_bytes()
    if vmem_limit_bytes is None:
        vmem_limit_bytes = int(vmem_cap * 0.85)   # leave Mosaic scratch headroom
    if tile_m is None:
        # 128-MiB VMEM parts (v5e/v6e): big token tile to clear the HBM ridge.
        # 64-MiB parts (v7x): 512 already clears the ridge; keep VMEM headroom.
        tile_m = 1024 if vmem_cap >= 100 * 1024 * 1024 else 512

    # --- token-dim tile -------------------------------------------------------
    # Sublane-packing multiple for x's dtype: 8 (f32) / 16 (bf16) / 32 (int8).
    pack = 8 * max(1, 4 // jnp.dtype(x.dtype).itemsize)
    if m >= tile_m:
        tm = tile_m
    else:
        tm = max(pack, ((m + pack - 1) // pack) * pack)
    m_pad = pl.cdiv(m, tm) * tm
    if m_pad != m:
        x2d = jnp.pad(x2d, ((0, m_pad - m), (0, 0)))

    # --- FFN-dim tile ---------------------------------------------------------
    tf = _choose_f_tile(f_pad, tile_f)

    grid_m = m_pad // tm
    grid_f = f_pad // tf
    grid = (grid_m, grid_f)

    # Advisory cost estimate so XLA schedules surrounding ops sensibly.
    act_bytes = jnp.dtype(x.dtype).itemsize
    w_bytes = jnp.dtype(w1_t.dtype).itemsize
    cost = pl.CostEstimate(
        flops=4 * m_pad * hidden * f_pad,
        transcendentals=m_pad * f_pad,
        bytes_accessed=(2 * m_pad * hidden * act_bytes
                        + grid_m * 2 * hidden * f_pad * w_bytes
                        + 4 * (f_pad + hidden)),
    )

    # TODO(synk): on v7x, single-buffer the j-invariant blocks (x tile, b2,
    #             output) via pipeline_mode=pl.Buffered(1) to reclaim VMEM.
    # TODO(synk): for decode-sized M on v7x, add a second "parallel" axis over
    #             the hidden/output dim so both TensorCores get work.
    out = pl.pallas_call(
        _make_ffn_kernel(approximate),
        out_shape=jax.ShapeDtypeStruct((m_pad, hidden), x.dtype),
        grid_spec=pltpu.PrefetchScalarGridSpec(
            num_scalar_prefetch=0,
            grid=grid,
            in_specs=[
                pl.BlockSpec((tm, hidden), lambda i, j: (i, 0)),   # x tile
                pl.BlockSpec((hidden, tf), lambda i, j: (0, j)),   # W1 (in,out)
                pl.BlockSpec((1, tf),      lambda i, j: (0, j)),   # b1 slab
                pl.BlockSpec((tf, hidden), lambda i, j: (j, 0)),   # W2 (in,out)
                pl.BlockSpec((1, hidden),  lambda i, j: (0, 0)),   # b2 resident
            ],
            out_specs=pl.BlockSpec((tm, hidden), lambda i, j: (i, 0)),
            scratch_shapes=[pltpu.VMEM((tm, hidden), jnp.float32)],
        ),
        compiler_params=pltpu.CompilerParams(
            dimension_semantics=("parallel", "arbitrary"),
            vmem_limit_bytes=vmem_limit_bytes,
        ),
        cost_estimate=cost,
    )(x2d, w1_t, b1, w2_t, b2)

    if m_pad != m:
        out = out[:m]
    return out.reshape(orig_shape)


def feed_forward_network_torch_layout(x, w1, b1, w2, b2, **kwargs):
    """Convenience wrapper for torch-layout weights (transposes per call).
    Prefer prepare_ffn_params() + feed_forward_network() in steady state."""
    w1_t, b1_2d, w2_t, b2_2d = prepare_ffn_params(w1, b1, w2, b2)
    return feed_forward_network(x, w1_t, b1_2d, w2_t, b2_2d, **kwargs)


# --------------------------------------------------------------------------- #
# Demo / self-check
# --------------------------------------------------------------------------- #
def _init_params(key, hidden_size, ffn_size, dtype=jnp.float32):
    # deterministic init mimicking nn.Linear's uniform(-1/sqrt(fan_in), ...)
    k1, k2, k3, k4 = jax.random.split(key, 4)
    bound1 = 1.0 / math.sqrt(hidden_size)
    bound2 = 1.0 / math.sqrt(ffn_size)
    w1 = jax.random.uniform(k1, (ffn_size, hidden_size), dtype, -bound1, bound1)
    b1 = jax.random.uniform(k2, (ffn_size,), dtype, -bound1, bound1)
    w2 = jax.random.uniform(k3, (hidden_size, ffn_size), dtype, -bound2, bound2)
    b2 = jax.random.uniform(k4, (hidden_size,), dtype, -bound2, bound2)
    return w1, b1, w2, b2


if __name__ == "__main__":
    key = jax.random.PRNGKey(0)
    k_x, k_p = jax.random.split(key)

    batch, seq, hidden_size, ffn_size = 2, 8, 32, 64
    x = jax.random.normal(k_x, (batch, seq, hidden_size), jnp.float32)
    w1, b1, w2, b2 = _init_params(k_p, hidden_size, ffn_size)

    # One-time layout prep, hoisted out of the forward path.
    w1_t, b1_2d, w2_t, b2_2d = prepare_ffn_params(w1, b1, w2, b2)

    fwd = jax.jit(lambda xx: feed_forward_network(xx, w1_t, b1_2d, w2_t, b2_2d))
    y = jax.block_until_ready(fwd(x))

    # plain-JAX reference (exact erf GELU) sanity check
    h_ref = x @ w1.T + b1
    h_ref = 0.5 * h_ref * (1.0 + jax.lax.erf(h_ref / math.sqrt(2.0)))
    y_ref = h_ref @ w2.T + b2
    assert y.shape == (batch, seq, hidden_size)
    err = float(jnp.max(jnp.abs(y - y_ref)))
    assert jnp.allclose(y, y_ref, atol=2e-5, rtol=2e-5), err

    print("KERNEL_OK")
</pallas_src>

<mosaic_0001>
module attributes {stable_mosaic.version = 11 : i64} {
  func.func @kernel(%arg0: i32, %arg1: i32, %arg2: memref<16x32xf32, #tpu.memory_space<vmem>>, %arg3: memref<32x128xf32, #tpu.memory_space<vmem>>, %arg4: memref<1x128xf32, #tpu.memory_space<vmem>>, %arg5: memref<128x32xf32, #tpu.memory_space<vmem>>, %arg6: memref<1x32xf32, #tpu.memory_space<vmem>>, %arg7: memref<16x32xf32, #tpu.memory_space<vmem>>, %arg8: memref<16x32xf32, #tpu.memory_space<vmem>>) attributes {dimension_semantics = [#tpu.dimension_semantics<parallel>, #tpu.dimension_semantics<arbitrary>], iteration_bounds = array<i64: 1, 1>, scalar_prefetch = 0 : i64, scratch_operands = 1 : i64, tpu.core_type = #tpu.core_type<tc>, window_params = [{transform_indices = @transform_0, window_bounds = array<i64: 16, 32>}, {transform_indices = @transform_1, window_bounds = array<i64: 32, 128>}, {transform_indices = @transform_2, window_bounds = array<i64: 1, 128>}, {transform_indices = @transform_3, window_bounds = array<i64: 128, 32>}, {pipeline_mode = #tpu.pipeline_mode<synchronous>, transform_indices = @transform_4, window_bounds = array<i64: 1, 32>}, {transform_indices = @transform_5, window_bounds = array<i64: 16, 32>}]} {
    %c0 = arith.constant 0 : index
    %c0_0 = arith.constant 0 : index
    %0 = vector.load %arg2[%c0, %c0_0] : memref<16x32xf32, #tpu.memory_space<vmem>>, vector<16x32xf32>
    %c0_1 = arith.constant 0 : index
    %c0_2 = arith.constant 0 : index
    %1 = vector.load %arg3[%c0_1, %c0_2] : memref<32x128xf32, #tpu.memory_space<vmem>>, vector<32x128xf32>
    %cst = arith.constant dense<0.000000e+00> : vector<16x128xf32>
    %2 = tpu.matmul %0, %1, %cst {dimension_numbers = #tpu.dot_dimension_numbers<[1], [0], [0], [1], [0, 0, 1, 1], [], []>} : vector<16x32xf32>, vector<32x128xf32>, vector<16x128xf32> -> vector<16x128xf32>
    %c0_3 = arith.constant 0 : index
    %c0_4 = arith.constant 0 : index
    %3 = vector.load %arg4[%c0_3, %c0_4] : memref<1x128xf32, #tpu.memory_space<vmem>>, vector<1x128xf32>
    %4 = vector.broadcast %3 : vector<1x128xf32> to vector<16x128xf32>
    %5 = arith.addf %2, %4 : vector<16x128xf32>
    %cst_5 = arith.constant 5.000000e-01 : f32
    %6 = vector.broadcast %cst_5 : f32 to vector<16x128xf32>
    %7 = arith.mulf %6, %5 : vector<16x128xf32>
    %cst_6 = arith.constant 0.707106769 : f32
    %8 = vector.broadcast %cst_6 : f32 to vector<16x128xf32>
    %9 = arith.mulf %5, %8 : vector<16x128xf32>
    %10 = math.erf %9 : vector<16x128xf32>
    %cst_7 = arith.constant 1.000000e+00 : f32
    %11 = vector.broadcast %cst_7 : f32 to vector<16x128xf32>
    %12 = arith.addf %11, %10 : vector<16x128xf32>
    %13 = arith.mulf %7, %12 : vector<16x128xf32>
    %c0_8 = arith.constant 0 : index
    %c0_9 = arith.constant 0 : index
    %14 = vector.load %arg5[%c0_8, %c0_9] : memref<128x32xf32, #tpu.memory_space<vmem>>, vector<128x32xf32>
    %cst_10 = arith.constant dense<0.000000e+00> : vector<16x32xf32>
    %15 = tpu.matmul %13, %14, %cst_10 {dimension_numbers = #tpu.dot_dimension_numbers<[1], [0], [0], [1], [0, 0, 1, 1], [], []>} : vector<16x128xf32>, vector<128x32xf32>, vector<16x32xf32> -> vector<16x32xf32>
    %c0_i32 = arith.constant 0 : i32
    %16 = arith.cmpi eq, %arg1, %c0_i32 : i32
    %17 = arith.extui %16 : i1 to i32
    %c0_i32_11 = arith.constant 0 : i32
    %18 = arith.cmpi ne, %17, %c0_i32_11 : i32
    scf.if %18 {
      %c0_16 = arith.constant 0 : index
      %c0_17 = arith.constant 0 : index
      %25 = vector.load %arg8[%c0_16, %c0_17] : memref<16x32xf32, #tpu.memory_space<vmem>>, vector<16x32xf32>
      tpu.vector_store %arg8[%c0_16, %c0_17], %15 {strides = array<i32>} : memref<16x32xf32, #tpu.memory_space<vmem>>, vector<16x32xf32>,
    } else {
    }
    %c0_i32_12 = arith.constant 0 : i32
    %19 = arith.cmpi ne, %arg1, %c0_i32_12 : i32
    %20 = arith.extui %19 : i1 to i32
    %c0_i32_13 = arith.constant 0 : i32
    %21 = arith.cmpi ne, %20, %c0_i32_13 : i32
    scf.if %21 {
      %c0_16 = arith.constant 0 : index
      %c0_17 = arith.constant 0 : index
      %25 = vector.load %arg8[%c0_16, %c0_17] : memref<16x32xf32, #tpu.memory_space<vmem>>, vector<16x32xf32>
      %26 = arith.addf %25, %15 : vector<16x32xf32>
      %c0_18 = arith.constant 0 : index
      %c0_19 = arith.constant 0 : index
      %27 = vector.load %arg8[%c0_18, %c0_19] : memref<16x32xf32, #tpu.memory_space<vmem>>, vector<16x32xf32>
      tpu.vector_store %arg8[%c0_18, %c0_19], %26 {strides = array<i32>} : memref<16x32xf32, #tpu.memory_space<vmem>>, vector<16x32xf32>,
    } else {
    }
    %c0_i32_14 = arith.constant 0 : i32
    %22 = arith.cmpi eq, %arg1, %c0_i32_14 : i32
    %23 = arith.extui %22 : i1 to i32
    %c0_i32_15 = arith.constant 0 : i32
    %24 = arith.cmpi ne, %23, %c0_i32_15 : i32
    scf.if %24 {
      %c0_16 = arith.constant 0 : index
      %c0_17 = arith.constant 0 : index
      %25 = vector.load %arg8[%c0_16, %c0_17] : memref<16x32xf32, #tpu.memory_space<vmem>>, vector<16x32xf32>
      %c0_18 = arith.constant 0 : index
      %c0_19 = arith.constant 0 : index
      %26 = vector.load %arg6[%c0_18, %c0_19] : memref<1x32xf32, #tpu.memory_space<vmem>>, vector<1x32xf32>
      %27 = vector.broadcast %26 : vector<1x32xf32> to vector<16x32xf32>
      %28 = arith.addf %25, %27 : vector<16x32xf32>
      %c0_20 = arith.constant 0 : index
      %c0_21 = arith.constant 0 : index
      %29 = vector.load %arg7[%c0_20, %c0_21] : memref<16x32xf32, #tpu.memory_space<vmem>>, vector<16x32xf32>
      tpu.vector_store %arg7[%c0_20, %c0_21], %28 {strides = array<i32>} : memref<16x32xf32, #tpu.memory_space<vmem>>, vector<16x32xf32>,
    } else {
    }
    return
  }
  func.func @transform_0(%arg0: i32, %arg1: i32) -> (i32, i32) {
    %c0_i32 = arith.constant 0 : i32
    %c0_i32_0 = arith.constant 0 : i32
    return %arg0, %c0_i32 : i32, i32
  }
  func.func @transform_1(%arg0: i32, %arg1: i32) -> (i32, i32) {
    %c0_i32 = arith.constant 0 : i32
    %c0_i32_0 = arith.constant 0 : i32
    return %c0_i32, %arg1 : i32, i32
  }
  func.func @transform_2(%arg0: i32, %arg1: i32) -> (i32, i32) {
    %c0_i32 = arith.constant 0 : i32
    %c0_i32_0 = arith.constant 0 : i32
    return %c0_i32, %arg1 : i32, i32
  }
  func.func @transform_3(%arg0: i32, %arg1: i32) -> (i32, i32) {
    %c0_i32 = arith.constant 0 : i32
    %c0_i32_0 = arith.constant 0 : i32
    return %arg1, %c0_i32 : i32, i32
  }
  func.func @transform_4(%arg0: i32, %arg1: i32) -> (i32, i32) {
    %c0_i32 = arith.constant 0 : i32
    %c0_i32_0 = arith.constant 0 : i32
    %c0_i32_1 = arith.constant 0 : i32
    return %c0_i32, %c0_i32_0 : i32, i32
  }
  func.func @transform_5(%arg0: i32, %arg1: i32) -> (i32, i32) {
    %c0_i32 = arith.constant 0 : i32
    %c0_i32_0 = arith.constant 0 : i32
    return %arg0, %c0_i32 : i32, i32
  }
}

</mosaic_0001>

<bundles_post_ra>
// kernel: _lambda_.1
= control target key start
LH: loop header
LB: loop body
LE: loop exit
PB: predicated region body
PF: predicated region fallthrough
CT: control target
= control target key end

     0   :  { %10 = vsyncpa [#allocation4], 0  ;;  %s520_s0 = inlined_call_operand.hbm [shape: f32[16,32], index: 0, kind: input, shape index: {}]   ;;  %s521_s1 = inlined_call_operand.hbm [shape: f32[32,128], index: 1, kind: input, shape index: {}]   ;;  %s522_s2 = inlined_call_operand.vmem [shape: f32[1,128], index: 2, kind: input, shape index: {}]   ;;  %s523_s3 = inlined_call_operand.hbm [shape: f32[128,32], index: 3, kind: input, shape index: {}]   ;;  %s524_s4 = inlined_call_operand.vmem [shape: f32[1,32], index: 4, kind: input, shape index: {}]   ;;  %s525_s5 = inlined_call_operand.hbm [shape: f32[16,32], index: 5, kind: output, shape index: {}]  }
   0x1   :  { %11 = vsyncpa [#allocation7], 0 }
   0x2   :  { %12 = vsyncpa [#allocation5], 0  ;;  %s30_s20 = sshll.u32 %s521_s1, 4  ;;  %s418_s21 = smov [#allocation6]   ;;  %s31_s20 = int_to_ptr.hbm [resolvable:$true] %s30_s20 }
   0x3   :  { %s32_s22 = sshll.u32 %s418_s21, 4  ;;  %s17_s25 = sshll.u32 %s520_s0, 4  ;;  %s33_s22 = int_to_ptr.vmem [resolvable:$true] %s32_s22  ;;  %s18_s25 = int_to_ptr.hbm [resolvable:$true] %s17_s25 }
   0x4   :  { %s419_s26 = smov 128   ;;  %s420_s27 = smov 8  }
   0x5   :  { %38 = dma.hbm_to_vmem [thread:$0]  %s31_s20, 512, %s33_s22, [#allocation7], %s419_s26, %s419_s26, %s420_s27  }
   0x6   :  { %s421_s28 = smov [#allocation3]   ;;  %s45_s1 = sshll.u32 %s523_s3, 4  ;;  %s46_s1 = int_to_ptr.hbm [resolvable:$true] %s45_s1 }
   0x7   :  { %s19_s29 = sshll.u32 %s421_s28, 4  ;;  %s422_s0 = smov [#allocation8]   ;;  %s20_s29 = int_to_ptr.vmem [resolvable:$true] %s19_s29 }
   0x8   :  { %25 = dma.hbm_to_vmem [thread:$0]  %s18_s25, 256, %s20_s29, [#allocation4], %s419_s26, %s419_s26, %s420_s27  }
   0x9   :  { %s47_s7 = sshll.u32 %s422_s0, 4  ;;  %s48_s7 = int_to_ptr.vmem [resolvable:$true] %s47_s7 }
   0xa   :  { %53 = dma.hbm_to_vmem [thread:$0]  %s46_s1, 2048, %s48_s7, [#allocation7], %s419_s26, %s419_s26, %s420_s27  }
   0xb   :  { %412 = dma.done.wait [#allocation4], 256  }
   0xc   :  { %413 = vsyncadd [#allocation4], 4294967040 }
   0xd   :  { %414 = dma.done.wait [#allocation7], 2560  }
   0xe   :  { %415 = vsyncadd [#allocation7], 4294964736  ;;  %v73_v0 = vld [vmem:[#allocation6 + $0x18] sm:$0xff]  ;;  %v72_v1 = vld [vmem:[#allocation6 + $0x10] sm:$0xff]  ;;  %vm78_vm0 = vcmask 261120   ;;  %s423_s10 = smov [#allocation9]  }
   0xf   :  { %97 = vmatpush.msra.mxu0 %v73_v0  ;;  %v71_v2 = vld [vmem:[#allocation6 + $0x8] sm:$0xff]  ;;  %v70_v3 = vld [vmem:[#allocation6] sm:$0xff]  ;;  %v68_v4 = vld [vmem:[#allocation3] sm:$0xff]  ;;  %s268_s11 = sshll.u32 %s423_s10, 4  ;;  %s270_s14 = sshll.u32 %s525_s5, 4  ;;  %s269_s11 = int_to_ptr.vmem [resolvable:$true] %s268_s11  ;;  %s271_s14 = int_to_ptr.hbm [resolvable:$true] %s270_s14 }
  0x10   :  { %v69_v5 = vld [vmem:[#allocation3 + $0x8] sm:$0xff]  ;;  %v210_v7 = vld [vmem:[#allocation8 + $0x70] sm:$0xff]  ;;  %v209_v8 = vld [vmem:[#allocation8 + $0x68] sm:$0xff] }
  0x11   :  { %98 = vmatpush.msra.mxu0 %v72_v1  ;;  %v211_v6 = vld [vmem:[#allocation8 + $0x78] sm:$0xff]  ;;  %v208_v9 = vld [vmem:[#allocation8 + $0x60] sm:$0xff]  ;;  %v206_v13 = vld [vmem:[#allocation8 + $0x50] sm:$0xff] }
  0x12   :  { %212 = vmatpush.msra.mxu1 %v211_v6  ;;  %288 = vmatpush.msra.mxu2 %v211_v6  ;;  %v310_v10 = vld [vmem:[%s522_s2] ss:$0 sm:$0xff]  ;;  %v207_v11 = vld [vmem:[#allocation8 + $0x58] sm:$0xff]  ;;  %v205_v15 = vld [vmem:[#allocation8 + $0x48] sm:$0xff] }
  0x13   :  { %99 = vmatpush.msra.mxu0 %v71_v2  ;;  %v204_v17 = vld [vmem:[#allocation8 + $0x40] sm:$0xff]  ;;  %v203_v19 = vld [vmem:[#allocation8 + $0x38] sm:$0xff]  ;;  %v202_v20 = vld [vmem:[#allocation8 + $0x30] sm:$0xff] }
  0x14   :  { %213 = vmatpush.msra.mxu1 %v210_v7  ;;  %289 = vmatpush.msra.mxu2 %v210_v7  ;;  %v201_v23 = vld [vmem:[#allocation8 + $0x28] sm:$0xff]  ;;  %v200_v27 = vld [vmem:[#allocation8 + $0x20] sm:$0xff]  ;;  %v199_v30 = vld [vmem:[#allocation8 + $0x18] sm:$0xff] }
  0x15   :  { %100 = vmatpush.msra.mxu0 %v70_v3  ;;  %v198_v34 = vld [vmem:[#allocation8 + $0x10] sm:$0xff]  ;;  %v197_v37 = vld [vmem:[#allocation8 + $0x8] sm:$0xff]  ;;  %v196_v42 = vld [vmem:[#allocation8] sm:$0xff] }
  0x16   :  { %284 = vmatmul.msk.f32.vlgmr.msra.gmra.mxu0 %vm78_vm0, %v68_v4  ;;  %214 = vmatpush.msra.mxu1 %v209_v8 }
  0x17   :  { %290 = vmatpush.msra.mxu2 %v209_v8 }
  0x18   :  { %215 = vmatpush.msra.mxu1 %v208_v9 }
  0x19   :  { %291 = vmatpush.msra.mxu2 %v208_v9 }
  0x1a   :  { %216 = vmatpush.msra.mxu1 %v207_v11 }
  0x1b   :  { %292 = vmatpush.msra.mxu2 %v207_v11 }
  0x1c   :  { %217 = vmatpush.msra.mxu1 %v206_v13 }
  0x1d   :  { %293 = vmatpush.msra.mxu2 %v206_v13 }
  0x1e   :  { %285 = vmatmul.msk.f32.gmra.mxu0 %vm78_vm0, %v69_v5  ;;  %218 = vmatpush.msra.mxu1 %v205_v15 }
  0x1f   :  { %294 = vmatpush.msra.mxu2 %v205_v15 }
  0x20   :  { %219 = vmatpush.msra.mxu1 %v204_v17 }
  0x21   :  { %295 = vmatpush.msra.mxu2 %v204_v17 }
  0x22   :  { %220 = vmatpush.msra.mxu1 %v203_v19 }
  0x23   :  { %296 = vmatpush.msra.mxu2 %v203_v19 }
  0x24   :  { %221 = vmatpush.msra.mxu1 %v202_v20 }
  0x25   :  { %297 = vmatpush.msra.mxu2 %v202_v20 }
  0x26   :  { %222 = vmatpush.msra.mxu1 %v201_v23 }
  0x27   :  { %298 = vmatpush.msra.mxu2 %v201_v23 }
  0x28   :  { %223 = vmatpush.msra.mxu1 %v200_v27 }
  0x29   :  { %299 = vmatpush.msra.mxu2 %v200_v27 }
  0x2a   :  { %224 = vmatpush.msra.mxu1 %v199_v30 }
  0x2b   :  { %300 = vmatpush.msra.mxu2 %v199_v30 }
  0x2c   :  { %225 = vmatpush.msra.mxu1 %v198_v34 }
  0x2d   :  { %301 = vmatpush.msra.mxu2 %v198_v34 }
  0x2e   :  { %226 = vmatpush.msra.mxu1 %v197_v37 }
  0x2f   :  { %302 = vmatpush.msra.mxu2 %v197_v37 }
  0x30   :  { %227 = vmatpush.msra.mxu1 %v196_v42 }
  0x31   :  { %303 = vmatpush.msra.mxu2 %v196_v42 }
  0x93   :  { %v102_v12 = vpop.f32.mrf.mxu0 }
  0x94   :  { %v477_v14 = vadd.f32 %v310_v10, %v102_v12 }
  0x96   :  { %v480_v16 = vmul.f32 0.70710677, %v477_v14 }
  0x98   :  { %v112_v18 = vmul.f32 %v480_v16, %v480_v16 }
  0x9a   :  { %v484_v21 = vmin.f32 %v112_v18, 16.0 }
  0x9b   :  { %v105_v22 = vpop.f32.mrf.mxu0 }
  0x9c   :  { %v114_v24 = vmul.f32 2.1237322e-06, %v484_v21  ;;  %v487_v25 = vadd.f32 %v310_v10, %v105_v22  ;;  %v125_v26 = vmul.f32 3.8918573e-05, %v484_v21 }
  0x9e   :  { %v115_v28 = vadd.f32 0.00028619796, %v114_v24  ;;  %v491_v29 = vmul.f32 0.70710677, %v487_v25  ;;  %v126_v31 = vadd.f32 0.001143296, %v125_v26 }
  0xa0   :  { %v116_v32 = vmul.f32 %v115_v28, %v484_v21  ;;  %v152_v33 = vmul.f32 %v491_v29, %v491_v29  ;;  %v127_v35 = vmul.f32 %v126_v31, %v484_v21 }
  0xa2   :  { %v153_v36 = vmin.f32 %v152_v33, 16.0  ;;  %v128_v38 = vadd.f32 0.014752088, %v127_v35  ;;  %v117_v39 = vadd.f32 0.0036580483, %v116_v32  ;;  %v108_v33 = vmul.f32 0.5, %v477_v14 }
  0xa3   :  { %v311_v14 = vld [vmem:[%s524_s4] ss:$0 sm:$0xff] }
  0xa4   :  { %v154_v40 = vmul.f32 2.1237322e-06, %v153_v36  ;;  %v165_v41 = vmul.f32 3.8918573e-05, %v153_v36  ;;  %v129_v43 = vmul.f32 %v128_v38, %v484_v21  ;;  %v118_v47 = vmul.f32 %v117_v39, %v484_v21 }
  0xa6   :  { %v155_v44 = vadd.f32 0.00028619796, %v154_v40  ;;  %v166_v45 = vadd.f32 0.001143296, %v165_v41  ;;  %v130_v46 = vadd.f32 0.112945676, %v129_v43 }
  0xa7   :  { %v119_v54 = vadd.f32 0.05243302, %v118_v47  ;;  %v109_v41 = vmul.f32 0.5, %v487_v25 }
  0xa8   :  { %v156_v48 = vmul.f32 %v155_v44, %v153_v36  ;;  %v167_v49 = vmul.f32 %v166_v45, %v153_v36  ;;  %v131_v50 = vmul.f32 %v130_v46, %v484_v21 }
  0xa9   :  { %v120_v60 = vmul.f32 %v119_v54, %v484_v21 }
  0xaa   :  { %v168_v51 = vadd.f32 0.014752088, %v167_v49  ;;  %v157_v52 = vadd.f32 0.0036580483, %v156_v48  ;;  %v132_v53 = vadd.f32 0.4994258, %v131_v50 }
  0xab   :  { %v121_v0 = vadd.f32 0.18741608, %v120_v60 }
  0xac   :  { %v169_v55 = vmul.f32 %v168_v51, %v153_v36  ;;  %v133_v56 = vmul.f32 %v132_v53, %v484_v21  ;;  %v158_v58 = vmul.f32 %v157_v52, %v153_v36 }
  0xad   :  { %v122_v5 = vmul.f32 %v121_v0, %v484_v21 }
  0xae   :  { %v170_v57 = vadd.f32 0.112945676, %v169_v55  ;;  %v134_v59 = vadd.f32 1.0, %v133_v56  ;;  %v159_v63 = vadd.f32 0.05243302, %v158_v58 }
  0xaf   :  { %v123_v10 = vadd.f32 1.1283791, %v122_v5 }
  0xb0   :  { %v171_v61 = vmul.f32 %v170_v57, %v153_v36  ;;  %312 = vrcp.f32 %v134_v59  ;;  %v160_v4 = vmul.f32 %v159_v63, %v153_v36  ;;  %v146_v9 = vand.u32 2147483648, %v134_v59 }
  0xb1   :  { %v144_v12 = vand.u32 2147483647, %v134_v59  ;;  %vm140_vm2 = vweird.f32 %v134_v59  ;;  %v124_v20 = vmul.f32 %v123_v10, %v480_v16 }
  0xb2   :  { %v172_v62 = vadd.f32 0.4994258, %v171_v61  ;;  %v161_v8 = vadd.f32 0.18741608, %v160_v4  ;;  %v147_v18 = vor.u32 1.1754944e-38, %v146_v9 }
  0xb3   :  { %vm145_vm4 = vcmp.eq.f32.partialorder %v144_v12, 8.507059e+37 }
  0xb4   :  { %v173_v1 = vmul.f32 %v172_v62, %v153_v36  ;;  %v162_v17 = vmul.f32 %v161_v8, %v153_v36 }
  0xb6   :  { %v174_v2 = vadd.f32 1.0, %v173_v1  ;;  %v313_v3 = vpop.eup %312  ;;  %v163_v27 = vadd.f32 1.1283791, %v162_v17 }
  0xb7   :  { %v136_v6 = vmul.f32 %v313_v3, %v134_v59  ;;  %vm141_vm1 = vweird.f32 %v313_v3 }
  0xb8   :  { %314 = vrcp.f32 %v174_v2  ;;  %vm142_vm3 = vmor %vm140_vm2, %vm141_vm1  ;;  %v186_v26 = vand.u32 2147483648, %v174_v2  ;;  %v184_v30 = vand.u32 2147483647, %v174_v2  ;;  %vm180_vm6 = vweird.f32 %v174_v2 }
  0xb9   :  { %v137_v7 = vsub.f32 1.0, %v136_v6  ;;  %v164_v16 = vmul.f32 %v163_v27, %v491_v29 }
  0xba   :  { %v187_v35 = vor.u32 1.1754944e-38, %v186_v26  ;;  %vm185_vm8 = vcmp.eq.f32.partialorder %v184_v30, 8.507059e+37 }
  0xbb   :  { %v138_v11 = vmul.f32 %v313_v3, %v137_v7 }
  0xbd   :  { %v139_v15 = vadd.f32 %v313_v3, %v138_v11 }
  0xbe   :  { %v315_v13 = vpop.eup %314 }
  0xbf   :  { %v176_v19 = vmul.f32 %v315_v13, %v174_v2  ;;  %v143_v22 = vsel %vm142_vm3, %v313_v3, %v139_v15  ;;  %vm181_vm5 = vweird.f32 %v315_v13 }
  0xc0   :  { %v148_v21 = vsel %vm145_vm4, %v147_v18, %v143_v22  ;;  %vm182_vm7 = vmor %vm180_vm6, %vm181_vm5 }
  0xc1   :  { %v177_v23 = vsub.f32 1.0, %v176_v19  ;;  %v149_v24 = vmul.f32 %v148_v21, %v124_v20 }
  0xc3   :  { %v178_v28 = vmul.f32 %v315_v13, %v177_v23  ;;  %v286_v31 = vclamps-f32 %v149_v24, 1.0 }
  0xc5   :  { %v179_v32 = vadd.f32 %v315_v13, %v178_v28  ;;  %v192_v34 = vadd.f32 1.0, %v286_v31 }
  0xc7   :  { %v183_v36 = vsel %vm182_vm7, %v315_v13, %v179_v32  ;;  %v194_v37 = vmul.f32 %v192_v34, %v108_v33 }
  0xc8   :  { %v188_v38 = vsel %vm185_vm8, %v187_v35, %v183_v36 }
  0xc9   :  { %v189_v39 = vmul.f32 %v188_v38, %v164_v16  ;;  %228 = vmatmul.f32.vlgmr.msra.gmra.mxu1 %v194_v37 }
  0xcb   :  { %v287_v40 = vclamps-f32 %v189_v39, 1.0 }
  0xcd   :  { %v193_v42 = vadd.f32 1.0, %v287_v40 }
  0xcf   :  { %v195_v43 = vmul.f32 %v193_v42, %v109_v41 }
  0xd1   :  { %231 = vmatmul.f32.vlgmr.msra.gmra.mxu2 %v195_v43 }
 0x146   :  { %v229_v44 = vpop.f32.mrf.mxu1 }
 0x147   :  { %239 = vst.msk [vmem:[#allocation2] sm:$0xff] %vm78_vm0, %v229_v44 }
 0x14e   :  { %v254_v29 = vld [vmem:[#allocation2] sm:$0xff] }
 0x14f   :  { %v260_v45 = vadd.f32 %v311_v14, %v254_v29 }
 0x151   :  { %262 = vst.msk [vmem:[#allocation9] sm:$0xff] %vm78_vm0, %v260_v45 }
 0x154   :  { %v232_v46 = vpop.f32.mrf.mxu2 }
 0x155   :  { %240 = vst.msk [vmem:[#allocation2 + $0x8] sm:$0xff] %vm78_vm0, %v232_v46 }
 0x15c   :  { %v255_v25 = vld [vmem:[#allocation2 + $0x8] sm:$0xff] }
 0x15d   :  { %v261_v47 = vadd.f32 %v311_v14, %v255_v25 }
 0x15f   :  { %263 = vst.msk [vmem:[#allocation9 + $0x8] sm:$0xff] %vm78_vm0, %v261_v47 }
 0x160   :  { %276 = dma.vmem_to_hbm [thread:$0]  %s269_s11, 256, %s271_s14, [#allocation5], %s419_s26, %s419_s26, %s420_s27  }
 0x161   :  { %416 = dma.done.wait [#allocation5], 256  }
 0x162   :  { %417 = vsyncadd [#allocation5], 4294967040 }
 0x163   :  { %281 = vsyncpa [#allocation4], 1 }
 0x164   :  { %282 = vsyncpa [#allocation7], 1 }
 0x165   :  { %283 = vsyncpa [#allocation5], 1 }

</bundles_post_ra>
